<compile_context>
chip_gen: v7x
topology: tpu7x:2x2x1
jax: 0.10.0
libtpu: 0.0.40
codegen_flags: <defaults>
</compile_context>

<pallas_src>
import jax
import jax.numpy as jnp
from jax.experimental import pallas as pl
from jax.experimental.pallas import tpu as pltpu

# ----------------------------- configuration -------------------------------
B = 2          # batch
S = 8          # sequence length
D = 32         # hidden_dim
HEADS = 4
HEAD_DIM = D // HEADS
FFN_MULT = 4
DFF = D * FFN_MULT
EPS = 1e-6
BS = B * S
NEG_BIAS = -1e30   # finite "masked" bias (avoids -inf -> NaN on fully-masked rows)

# Rows of the packed bias / LayerNorm-vector slab (shape (N_VEC_ROWS, VEC_W), f32).
VEC_W = max(4 * D, DFF)
ROW_QKV_BIAS = 0   # lanes [0 : 3*D]  = bq | bk | bv
ROW_B1       = 1   # lanes [0 : DFF]  = b1
ROW_BO       = 2   # lanes [0 : D]
ROW_B2       = 3   # lanes [0 : D]
ROW_GM       = 4   # lanes [0 : D]  LayerNorm (post-MHA) gamma
ROW_BM       = 5   # lanes [0 : D]  LayerNorm (post-MHA) beta
ROW_GF       = 6   # lanes [0 : D]  LayerNorm (post-FFN) gamma
ROW_BF       = 7   # lanes [0 : D]  LayerNorm (post-FFN) beta
N_VEC_ROWS   = 8


# ------------------------------- kernel ------------------------------------
def encoder_kernel(x_ref, bias_ref, wqkvo_ref, vecs_ref, w1_ref, w2_ref, o_ref):
    x = x_ref[...]                                   # (BS, D)  f32
    bias = bias_ref[...]                             # (BS, BS) f32 additive mask
    vecs = vecs_ref[...]                             # (8, VEC_W) f32
    scale = jnp.float32(HEAD_DIM ** -0.5)

    # ---- fused QKV(+O) projection: one lane-dense MXU push -----------------
    # Columns [0:D]=x@Wq, [D:2D]=x@Wk, [2D:3D]=x@Wv, [3D:4D]=x@Wo (ignored).
    x_bf = x.astype(jnp.bfloat16)
    proj = jnp.dot(x_bf, wqkvo_ref[...], preferred_element_type=jnp.float32)   # (BS, 4D)
    proj = proj + vecs[ROW_QKV_BIAS:ROW_QKV_BIAS + 1, :4 * D]                   # bq|bk|bv|0

    qb = proj[:, 0:D].astype(jnp.bfloat16)
    kb = proj[:, D:2 * D].astype(jnp.bfloat16)
    vb = proj[:, 2 * D:3 * D].astype(jnp.bfloat16)

    # ---- per-head attention; lane-place contexts, then ONE Wo matmul -------
    ctx_heads = []
    for h in range(HEADS):
        lo = h * HEAD_DIM
        hi = lo + HEAD_DIM
        s = jax.lax.dot_general(                      # (BS, BS) f32 accumulate
            qb[:, lo:hi], kb[:, lo:hi],
            (((1,), (1,)), ((), ())),
            preferred_element_type=jnp.float32,
        ) * scale + bias
        m = jnp.max(s, axis=-1, keepdims=True)
        e = jnp.exp(s - m)
        denom = jnp.sum(e, axis=-1, keepdims=True)
        p = (e * pl.reciprocal(denom, approx=True)).astype(jnp.bfloat16)   # EUP recip
        ctx_heads.append(jnp.dot(p, vb[:, lo:hi],
                                 preferred_element_type=jnp.float32))      # (BS, hd)
    ctx = jnp.concatenate(ctx_heads, axis=-1).astype(jnp.bfloat16)         # (BS, D)

    wo = wqkvo_ref[:, 3 * D:4 * D]                                         # (D, D) bf16
    mha = jnp.dot(ctx, wo, preferred_element_type=jnp.float32) \
          + vecs[ROW_BO:ROW_BO + 1, :D]

    # ---- residual + LayerNorm (post-MHA), f32 ------------------------------
    x1 = mha + x
    mu = jnp.mean(x1, axis=-1, keepdims=True)
    var = jnp.mean((x1 - mu) ** 2, axis=-1, keepdims=True)
    xn = (x1 - mu) * jax.lax.rsqrt(var + EPS) * vecs[ROW_GM:ROW_GM + 1, :D] \
         + vecs[ROW_BM:ROW_BM + 1, :D]

    # ---- FFN: linear -> (dropout: identity) -> GELU(tanh) -> linear --------
    h1 = jnp.dot(xn.astype(jnp.bfloat16), w1_ref[...],
                 preferred_element_type=jnp.float32) + vecs[ROW_B1:ROW_B1 + 1, :DFF]
    h1 = jax.nn.gelu(h1, approximate=True)            # tanh form -> EUP slot
    ffn_out = jnp.dot(h1.astype(jnp.bfloat16), w2_ref[...],
                      preferred_element_type=jnp.float32) + vecs[ROW_B2:ROW_B2 + 1, :D]

    # ---- residual + LayerNorm (post-FFN), f32 ------------------------------
    x2 = ffn_out + xn
    mu2 = jnp.mean(x2, axis=-1, keepdims=True)
    var2 = jnp.mean((x2 - mu2) ** 2, axis=-1, keepdims=True)
    out = (x2 - mu2) * jax.lax.rsqrt(var2 + EPS) * vecs[ROW_GF:ROW_GF + 1, :D] \
          + vecs[ROW_BF:ROW_BF + 1, :D]

    o_ref[...] = out.astype(o_ref.dtype)


# ------------------------------- wrapper ------------------------------------
def _attention_bias(mask):
    """(B,1,S,S) keep-mask -> (B*S, B*S) block-diagonal additive bias."""
    keep = jax.scipy.linalg.block_diag(
        *[(mask[b, 0] != 0).astype(jnp.float32) for b in range(B)]
    )                                                       # (BS, BS), 1 = keep
    return jnp.where(keep > 0, 0.0, NEG_BIAS).astype(jnp.float32)


def pack_params(params):
    """Pack the 16 PyTorch-style tensors into 4 lane-dense kernel buffers."""
    (wq, bq, wk, bk, wv, bv, wo, bo, gm, bm, w1, b1, w2, b2, gf, bf) = params
    w_qkvo = jnp.concatenate([wq, wk, wv, wo], axis=1).astype(jnp.bfloat16)   # (D, 4D)

    vecs = jnp.zeros((N_VEC_ROWS, VEC_W), jnp.float32)
    qkv_bias = jnp.concatenate([bq[0], bk[0], bv[0]])                         # (3D,)
    vecs = vecs.at[ROW_QKV_BIAS, :3 * D].set(qkv_bias)
    vecs = vecs.at[ROW_B1, :DFF].set(b1[0])
    vecs = vecs.at[ROW_BO, :D].set(bo[0])
    vecs = vecs.at[ROW_B2, :D].set(b2[0])
    vecs = vecs.at[ROW_GM, :D].set(gm[0])
    vecs = vecs.at[ROW_BM, :D].set(bm[0])
    vecs = vecs.at[ROW_GF, :D].set(gf[0])
    vecs = vecs.at[ROW_BF, :D].set(bf[0])

    return (w_qkvo, vecs, w1.astype(jnp.bfloat16), w2.astype(jnp.bfloat16))


# Advisory cost estimate so XLA schedules surrounding ops around the custom call.
_FLOPS = (2 * BS * D * 4 * D                                   # fused qkv(+o)
          + HEADS * (2 * BS * HEAD_DIM * BS + 2 * BS * BS * HEAD_DIM)  # scores + ctx
          + 2 * BS * D * D + 2 * BS * D * DFF + 2 * BS * DFF * D       # Wo, W1, W2
          + 20 * BS * D)                                        # elementwise (rough)
_TRANSC = HEADS * BS * BS + HEADS * BS + BS * DFF + 2 * BS      # exp, recip, tanh, rsqrt
_BYTES = (BS * D * 4 + BS * BS * 4 + D * 4 * D * 2 + N_VEC_ROWS * VEC_W * 4
          + D * DFF * 2 + DFF * D * 2 + BS * D * 4)


@jax.jit
def encoder_forward(x, mask, packed):
    w_qkvo, vecs, w1, w2 = packed

    x2d = x.reshape(BS, D)           # fold (B, S) into the sublane axis (free reshape)
    bias = _attention_bias(mask)     # TODO(synk): could be built in-kernel from a
                                     # scalar-prefetched keep vector to drop 1 descriptor.

    vmem_specs = [pl.BlockSpec(memory_space=pltpu.MemorySpace.VMEM) for _ in range(6)]

    out2d = pl.pallas_call(
        encoder_kernel,
        out_shape=jax.ShapeDtypeStruct((BS, D), jnp.float32),
        in_specs=vmem_specs,
        out_specs=pl.BlockSpec(memory_space=pltpu.MemorySpace.VMEM),
        cost_estimate=pl.CostEstimate(flops=_FLOPS, transcendentals=_TRANSC,
                                      bytes_accessed=_BYTES),
    )(x2d, bias, w_qkvo, vecs, w1, w2)

    return out2d.reshape(B, S, D)


# --------------------------- pure-JAX reference ------------------------------
def encoder_reference(x, mask, params):
    (wq, bq, wk, bk, wv, bv, wo, bo, gm, bm, w1, b1, w2, b2, gf, bf) = params
    b, s, d = x.shape
    scale = HEAD_DIM ** -0.5

    def proj(x, w, bb):
        return x @ w + bb[0]

    q = proj(x, wq, bq).reshape(b, s, HEADS, HEAD_DIM).transpose(0, 2, 1, 3)
    k = proj(x, wk, bk).reshape(b, s, HEADS, HEAD_DIM).transpose(0, 2, 1, 3)
    v = proj(x, wv, bv).reshape(b, s, HEADS, HEAD_DIM).transpose(0, 2, 1, 3)
    scores = jnp.einsum("bhqd,bhkd->bhqk", q, k) * scale
    scores = jnp.where(mask == 0, -jnp.inf, scores)
    w = jax.nn.softmax(scores, axis=-1)
    out = jnp.einsum("bhqk,bhkd->bhqd", w, v).transpose(0, 2, 1, 3).reshape(b, s, d)
    mha = proj(out, wo, bo)

    def ln(x, g, bt):
        mu = jnp.mean(x, axis=-1, keepdims=True)
        var = jnp.mean((x - mu) ** 2, axis=-1, keepdims=True)
        return (x - mu) / jnp.sqrt(var + EPS) * g[0] + bt[0]

    x = ln(mha + x, gm, bm)
    h = jax.nn.gelu(proj(x, w1, b1), approximate=False)   # PyTorch nn.GELU() = exact erf
    f = proj(h, w2, b2)
    return ln(f + x, gf, bf)


# --------------------------------- main --------------------------------------
if __name__ == "__main__":
    key = jax.random.PRNGKey(0)
    keys = jax.random.split(key, 16)

    def init_w(k, shape, fan_in):
        return (jax.random.normal(k, shape, jnp.float32) / jnp.sqrt(fan_in)).astype(jnp.float32)

    params = (
        init_w(keys[0], (D, D), D),   0.01 * jax.random.normal(keys[1], (1, D), jnp.float32),    # Wq, bq
        init_w(keys[2], (D, D), D),   0.01 * jax.random.normal(keys[3], (1, D), jnp.float32),    # Wk, bk
        init_w(keys[4], (D, D), D),   0.01 * jax.random.normal(keys[5], (1, D), jnp.float32),    # Wv, bv
        init_w(keys[6], (D, D), D),   0.01 * jax.random.normal(keys[7], (1, D), jnp.float32),    # Wo, bo
        jnp.ones((1, D), jnp.float32), jnp.zeros((1, D), jnp.float32),                           # norm_mha
        init_w(keys[8], (D, DFF), D), 0.01 * jax.random.normal(keys[9], (1, DFF), jnp.float32),  # l1
        init_w(keys[10], (DFF, D), DFF), 0.01 * jax.random.normal(keys[11], (1, D), jnp.float32),# l2
        jnp.ones((1, D), jnp.float32), jnp.zeros((1, D), jnp.float32),                           # norm_ffn
    )

    x = jax.random.normal(keys[12], (B, S, D), jnp.float32)
    # padding-style mask: batch 1 masks out the last 2 key positions
    mask = jnp.ones((B, 1, S, S), jnp.float32)
    mask = mask.at[1, :, :, S - 2:].set(0.0)

    packed = pack_params(params)     # one-time packing into lane-dense kernel buffers

    out = encoder_forward(x, mask, packed)
    out = jax.block_until_ready(out)

    ref = encoder_reference(x, mask, params)
    assert out.shape == (B, S, D)
    # Tolerance sized for bf16 matmul operands (f32 accumulate), tanh-GELU vs exact erf,
    # and the EUP approximate-reciprocal softmax normalization.  A lane-slice /
    # packing bug would produce O(1) errors and is still caught.
    assert jnp.allclose(out, ref, atol=3e-2, rtol=3e-2), (
        f"max abs err {jnp.max(jnp.abs(out - ref))}")

    print("KERNEL_OK")
</pallas_src>

<mosaic_0001>
module attributes {stable_mosaic.version = 11 : i64} {
  func.func @encoder_kernel(%arg0: memref<16x32xf32, #tpu.memory_space<vmem>>, %arg1: memref<16x16xf32, #tpu.memory_space<vmem>>, %arg2: memref<32x128xbf16, #tpu.memory_space<vmem>>, %arg3: memref<8x128xf32, #tpu.memory_space<vmem>>, %arg4: memref<32x128xbf16, #tpu.memory_space<vmem>>, %arg5: memref<128x32xbf16, #tpu.memory_space<vmem>>, %arg6: memref<16x32xf32, #tpu.memory_space<vmem>>) attributes {dimension_semantics = [], scalar_prefetch = 0 : i64, scratch_operands = 0 : i64, tpu.core_type = #tpu.core_type<tc>} {
    %c0 = arith.constant 0 : index
    %c0_0 = arith.constant 0 : index
    %0 = vector.load %arg0[%c0, %c0_0] : memref<16x32xf32, #tpu.memory_space<vmem>>, vector<16x32xf32>
    %c0_1 = arith.constant 0 : index
    %c0_2 = arith.constant 0 : index
    %1 = vector.load %arg1[%c0_1, %c0_2] : memref<16x16xf32, #tpu.memory_space<vmem>>, vector<16x16xf32>
    %c0_3 = arith.constant 0 : index
    %c0_4 = arith.constant 0 : index
    %2 = vector.load %arg3[%c0_3, %c0_4] : memref<8x128xf32, #tpu.memory_space<vmem>>, vector<8x128xf32>
    %3 = arith.truncf %0 : vector<16x32xf32> to vector<16x32xbf16>
    %c0_5 = arith.constant 0 : index
    %c0_6 = arith.constant 0 : index
    %4 = vector.load %arg2[%c0_5, %c0_6] : memref<32x128xbf16, #tpu.memory_space<vmem>>, vector<32x128xbf16>
    %cst = arith.constant dense<0.000000e+00> : vector<16x128xf32>
    %5 = tpu.matmul %3, %4, %cst {dimension_numbers = #tpu.dot_dimension_numbers<[1], [0], [0], [1], [0, 0, 1, 1], [], []>} : vector<16x32xbf16>, vector<32x128xbf16>, vector<16x128xf32> -> vector<16x128xf32>
    %6 = vector.extract_strided_slice %2 {offsets = [0, 0], sizes = [1, 128], strides = [1, 1]} : vector<8x128xf32> to vector<1x128xf32>
    %7 = vector.broadcast %6 : vector<1x128xf32> to vector<16x128xf32>
    %8 = arith.addf %5, %7 : vector<16x128xf32>
    %9 = vector.extract_strided_slice %8 {offsets = [0, 0], sizes = [16, 32], strides = [1, 1]} : vector<16x128xf32> to vector<16x32xf32>
    %10 = arith.truncf %9 : vector<16x32xf32> to vector<16x32xbf16>
    %11 = vector.extract_strided_slice %8 {offsets = [0, 32], sizes = [16, 32], strides = [1, 1]} : vector<16x128xf32> to vector<16x32xf32>
    %12 = arith.truncf %11 : vector<16x32xf32> to vector<16x32xbf16>
    %13 = vector.extract_strided_slice %8 {offsets = [0, 64], sizes = [16, 32], strides = [1, 1]} : vector<16x128xf32> to vector<16x32xf32>
    %14 = arith.truncf %13 : vector<16x32xf32> to vector<16x32xbf16>
    %15 = vector.extract_strided_slice %10 {offsets = [0, 0], sizes = [16, 8], strides = [1, 1]} : vector<16x32xbf16> to vector<16x8xbf16>
    %16 = vector.extract_strided_slice %12 {offsets = [0, 0], sizes = [16, 8], strides = [1, 1]} : vector<16x32xbf16> to vector<16x8xbf16>
    %cst_7 = arith.constant dense<0.000000e+00> : vector<16x16xf32>
    %17 = tpu.matmul %15, %16, %cst_7 {dimension_numbers = #tpu.dot_dimension_numbers<[1], [1], [0], [0], [0, 0, 1, 0], [], []>} : vector<16x8xbf16>, vector<16x8xbf16>, vector<16x16xf32> -> vector<16x16xf32>
    %cst_8 = arith.constant 0.353553385 : f32
    %18 = vector.broadcast %cst_8 : f32 to vector<16x16xf32>
    %19 = arith.mulf %17, %18 : vector<16x16xf32>
    %20 = arith.addf %19, %1 : vector<16x16xf32>
    %cst_9 = arith.constant dense<0xFF800000> : vector<16xf32>
    %21 = vector.multi_reduction <maximumf>, %20, %cst_9 [1] : vector<16x16xf32> to vector<16xf32>
    %22 = vector.shape_cast %21 : vector<16xf32> to vector<16x1xf32>
    %23 = vector.broadcast %22 : vector<16x1xf32> to vector<16x16xf32>
    %24 = arith.subf %20, %23 : vector<16x16xf32>
    %25 = math.exp %24 : vector<16x16xf32>
    %cst_10 = arith.constant dense<0.000000e+00> : vector<16xf32>
    %26 = vector.multi_reduction <add>, %25, %cst_10 [1] : vector<16x16xf32> to vector<16xf32>
    %27 = vector.shape_cast %26 : vector<16xf32> to vector<16x1xf32>
    %28 = tpu.reciprocal %27 {approx = true} : vector<16x1xf32> -> vector<16x1xf32>
    %29 = vector.broadcast %28 : vector<16x1xf32> to vector<16x16xf32>
    %30 = arith.mulf %25, %29 : vector<16x16xf32>
    %31 = arith.truncf %30 : vector<16x16xf32> to vector<16x16xbf16>
    %32 = vector.extract_strided_slice %14 {offsets = [0, 0], sizes = [16, 8], strides = [1, 1]} : vector<16x32xbf16> to vector<16x8xbf16>
    %cst_11 = arith.constant dense<0.000000e+00> : vector<16x8xf32>
    %33 = tpu.matmul %31, %32, %cst_11 {dimension_numbers = #tpu.dot_dimension_numbers<[1], [0], [0], [1], [0, 0, 1, 1], [], []>} : vector<16x16xbf16>, vector<16x8xbf16>, vector<16x8xf32> -> vector<16x8xf32>
    %34 = vector.extract_strided_slice %10 {offsets = [0, 8], sizes = [16, 8], strides = [1, 1]} : vector<16x32xbf16> to vector<16x8xbf16>
    %35 = vector.extract_strided_slice %12 {offsets = [0, 8], sizes = [16, 8], strides = [1, 1]} : vector<16x32xbf16> to vector<16x8xbf16>
    %cst_12 = arith.constant dense<0.000000e+00> : vector<16x16xf32>
    %36 = tpu.matmul %34, %35, %cst_12 {dimension_numbers = #tpu.dot_dimension_numbers<[1], [1], [0], [0], [0, 0, 1, 0], [], []>} : vector<16x8xbf16>, vector<16x8xbf16>, vector<16x16xf32> -> vector<16x16xf32>
    %cst_13 = arith.constant 0.353553385 : f32
    %37 = vector.broadcast %cst_13 : f32 to vector<16x16xf32>
    %38 = arith.mulf %36, %37 : vector<16x16xf32>
    %39 = arith.addf %38, %1 : vector<16x16xf32>
    %cst_14 = arith.constant dense<0xFF800000> : vector<16xf32>
    %40 = vector.multi_reduction <maximumf>, %39, %cst_14 [1] : vector<16x16xf32> to vector<16xf32>
    %41 = vector.shape_cast %40 : vector<16xf32> to vector<16x1xf32>
    %42 = vector.broadcast %41 : vector<16x1xf32> to vector<16x16xf32>
    %43 = arith.subf %39, %42 : vector<16x16xf32>
    %44 = math.exp %43 : vector<16x16xf32>
    %cst_15 = arith.constant dense<0.000000e+00> : vector<16xf32>
    %45 = vector.multi_reduction <add>, %44, %cst_15 [1] : vector<16x16xf32> to vector<16xf32>
    %46 = vector.shape_cast %45 : vector<16xf32> to vector<16x1xf32>
    %47 = tpu.reciprocal %46 {approx = true} : vector<16x1xf32> -> vector<16x1xf32>
    %48 = vector.broadcast %47 : vector<16x1xf32> to vector<16x16xf32>
    %49 = arith.mulf %44, %48 : vector<16x16xf32>
    %50 = arith.truncf %49 : vector<16x16xf32> to vector<16x16xbf16>
    %51 = vector.extract_strided_slice %14 {offsets = [0, 8], sizes = [16, 8], strides = [1, 1]} : vector<16x32xbf16> to vector<16x8xbf16>
    %cst_16 = arith.constant dense<0.000000e+00> : vector<16x8xf32>
    %52 = tpu.matmul %50, %51, %cst_16 {dimension_numbers = #tpu.dot_dimension_numbers<[1], [0], [0], [1], [0, 0, 1, 1], [], []>} : vector<16x16xbf16>, vector<16x8xbf16>, vector<16x8xf32> -> vector<16x8xf32>
    %53 = vector.extract_strided_slice %10 {offsets = [0, 16], sizes = [16, 8], strides = [1, 1]} : vector<16x32xbf16> to vector<16x8xbf16>
    %54 = vector.extract_strided_slice %12 {offsets = [0, 16], sizes = [16, 8], strides = [1, 1]} : vector<16x32xbf16> to vector<16x8xbf16>
    %cst_17 = arith.constant dense<0.000000e+00> : vector<16x16xf32>
    %55 = tpu.matmul %53, %54, %cst_17 {dimension_numbers = #tpu.dot_dimension_numbers<[1], [1], [0], [0], [0, 0, 1, 0], [], []>} : vector<16x8xbf16>, vector<16x8xbf16>, vector<16x16xf32> -> vector<16x16xf32>
    %cst_18 = arith.constant 0.353553385 : f32
    %56 = vector.broadcast %cst_18 : f32 to vector<16x16xf32>
    %57 = arith.mulf %55, %56 : vector<16x16xf32>
    %58 = arith.addf %57, %1 : vector<16x16xf32>
    %cst_19 = arith.constant dense<0xFF800000> : vector<16xf32>
    %59 = vector.multi_reduction <maximumf>, %58, %cst_19 [1] : vector<16x16xf32> to vector<16xf32>
    %60 = vector.shape_cast %59 : vector<16xf32> to vector<16x1xf32>
    %61 = vector.broadcast %60 : vector<16x1xf32> to vector<16x16xf32>
    %62 = arith.subf %58, %61 : vector<16x16xf32>
    %63 = math.exp %62 : vector<16x16xf32>
    %cst_20 = arith.constant dense<0.000000e+00> : vector<16xf32>
    %64 = vector.multi_reduction <add>, %63, %cst_20 [1] : vector<16x16xf32> to vector<16xf32>
    %65 = vector.shape_cast %64 : vector<16xf32> to vector<16x1xf32>
    %66 = tpu.reciprocal %65 {approx = true} : vector<16x1xf32> -> vector<16x1xf32>
    %67 = vector.broadcast %66 : vector<16x1xf32> to vector<16x16xf32>
    %68 = arith.mulf %63, %67 : vector<16x16xf32>
    %69 = arith.truncf %68 : vector<16x16xf32> to vector<16x16xbf16>
    %70 = vector.extract_strided_slice %14 {offsets = [0, 16], sizes = [16, 8], strides = [1, 1]} : vector<16x32xbf16> to vector<16x8xbf16>
    %cst_21 = arith.constant dense<0.000000e+00> : vector<16x8xf32>
    %71 = tpu.matmul %69, %70, %cst_21 {dimension_numbers = #tpu.dot_dimension_numbers<[1], [0], [0], [1], [0, 0, 1, 1], [], []>} : vector<16x16xbf16>, vector<16x8xbf16>, vector<16x8xf32> -> vector<16x8xf32>
    %72 = vector.extract_strided_slice %10 {offsets = [0, 24], sizes = [16, 8], strides = [1, 1]} : vector<16x32xbf16> to vector<16x8xbf16>
    %73 = vector.extract_strided_slice %12 {offsets = [0, 24], sizes = [16, 8], strides = [1, 1]} : vector<16x32xbf16> to vector<16x8xbf16>
    %cst_22 = arith.constant dense<0.000000e+00> : vector<16x16xf32>
    %74 = tpu.matmul %72, %73, %cst_22 {dimension_numbers = #tpu.dot_dimension_numbers<[1], [1], [0], [0], [0, 0, 1, 0], [], []>} : vector<16x8xbf16>, vector<16x8xbf16>, vector<16x16xf32> -> vector<16x16xf32>
    %cst_23 = arith.constant 0.353553385 : f32
    %75 = vector.broadcast %cst_23 : f32 to vector<16x16xf32>
    %76 = arith.mulf %74, %75 : vector<16x16xf32>
    %77 = arith.addf %76, %1 : vector<16x16xf32>
    %cst_24 = arith.constant dense<0xFF800000> : vector<16xf32>
    %78 = vector.multi_reduction <maximumf>, %77, %cst_24 [1] : vector<16x16xf32> to vector<16xf32>
    %79 = vector.shape_cast %78 : vector<16xf32> to vector<16x1xf32>
    %80 = vector.broadcast %79 : vector<16x1xf32> to vector<16x16xf32>
    %81 = arith.subf %77, %80 : vector<16x16xf32>
    %82 = math.exp %81 : vector<16x16xf32>
    %cst_25 = arith.constant dense<0.000000e+00> : vector<16xf32>
    %83 = vector.multi_reduction <add>, %82, %cst_25 [1] : vector<16x16xf32> to vector<16xf32>
    %84 = vector.shape_cast %83 : vector<16xf32> to vector<16x1xf32>
    %85 = tpu.reciprocal %84 {approx = true} : vector<16x1xf32> -> vector<16x1xf32>
    %86 = vector.broadcast %85 : vector<16x1xf32> to vector<16x16xf32>
    %87 = arith.mulf %82, %86 : vector<16x16xf32>
    %88 = arith.truncf %87 : vector<16x16xf32> to vector<16x16xbf16>
    %89 = vector.extract_strided_slice %14 {offsets = [0, 24], sizes = [16, 8], strides = [1, 1]} : vector<16x32xbf16> to vector<16x8xbf16>
    %cst_26 = arith.constant dense<0.000000e+00> : vector<16x8xf32>
    %90 = tpu.matmul %88, %89, %cst_26 {dimension_numbers = #tpu.dot_dimension_numbers<[1], [0], [0], [1], [0, 0, 1, 1], [], []>} : vector<16x16xbf16>, vector<16x8xbf16>, vector<16x8xf32> -> vector<16x8xf32>
    %91 = tpu.concatenate %33, %52, %71, %90 in 1 : vector<16x8xf32>, vector<16x8xf32>, vector<16x8xf32>, vector<16x8xf32> -> vector<16x32xf32>
    %92 = arith.truncf %91 : vector<16x32xf32> to vector<16x32xbf16>
    %c0_27 = arith.constant 0 : index
    %c96 = arith.constant 96 : index
    %93 = vector.load %arg2[%c0_27, %c96] : memref<32x128xbf16, #tpu.memory_space<vmem>>, vector<32x32xbf16>
    %cst_28 = arith.constant dense<0.000000e+00> : vector<16x32xf32>
    %94 = tpu.matmul %92, %93, %cst_28 {dimension_numbers = #tpu.dot_dimension_numbers<[1], [0], [0], [1], [0, 0, 1, 1], [], []>} : vector<16x32xbf16>, vector<32x32xbf16>, vector<16x32xf32> -> vector<16x32xf32>
    %95 = vector.extract_strided_slice %2 {offsets = [2, 0], sizes = [1, 32], strides = [1, 1]} : vector<8x128xf32> to vector<1x32xf32>
    %96 = vector.broadcast %95 : vector<1x32xf32> to vector<16x32xf32>
    %97 = arith.addf %94, %96 : vector<16x32xf32>
    %98 = arith.addf %97, %0 : vector<16x32xf32>
    %cst_29 = arith.constant dense<0.000000e+00> : vector<16xf32>
    %99 = vector.multi_reduction <add>, %98, %cst_29 [1] : vector<16x32xf32> to vector<16xf32>
    %100 = vector.shape_cast %99 : vector<16xf32> to vector<16x1xf32>
    %cst_30 = arith.constant 3.200000e+01 : f32
    %101 = vector.broadcast %cst_30 : f32 to vector<16x1xf32>
    %102 = arith.divf %100, %101 : vector<16x1xf32>
    %103 = vector.broadcast %102 : vector<16x1xf32> to vector<16x32xf32>
    %104 = arith.subf %98, %103 : vector<16x32xf32>
    %105 = arith.mulf %104, %104 : vector<16x32xf32>
    %cst_31 = arith.constant dense<0.000000e+00> : vector<16xf32>
    %106 = vector.multi_reduction <add>, %105, %cst_31 [1] : vector<16x32xf32> to vector<16xf32>
    %107 = vector.shape_cast %106 : vector<16xf32> to vector<16x1xf32>
    %cst_32 = arith.constant 3.200000e+01 : f32
    %108 = vector.broadcast %cst_32 : f32 to vector<16x1xf32>
    %109 = arith.divf %107, %108 : vector<16x1xf32>
    %110 = vector.broadcast %102 : vector<16x1xf32> to vector<16x32xf32>
    %111 = arith.subf %98, %110 : vector<16x32xf32>
    %cst_33 = arith.constant 9.99999997E-7 : f32
    %112 = vector.broadcast %cst_33 : f32 to vector<16x1xf32>
    %113 = arith.addf %109, %112 : vector<16x1xf32>
    %114 = math.rsqrt %113 : vector<16x1xf32>
    %115 = vector.broadcast %114 : vector<16x1xf32> to vector<16x32xf32>
    %116 = arith.mulf %111, %115 : vector<16x32xf32>
    %117 = vector.extract_strided_slice %2 {offsets = [4, 0], sizes = [1, 32], strides = [1, 1]} : vector<8x128xf32> to vector<1x32xf32>
    %118 = vector.broadcast %117 : vector<1x32xf32> to vector<16x32xf32>
    %119 = arith.mulf %116, %118 : vector<16x32xf32>
    %120 = vector.extract_strided_slice %2 {offsets = [5, 0], sizes = [1, 32], strides = [1, 1]} : vector<8x128xf32> to vector<1x32xf32>
    %121 = vector.broadcast %120 : vector<1x32xf32> to vector<16x32xf32>
    %122 = arith.addf %119, %121 : vector<16x32xf32>
    %123 = arith.truncf %122 : vector<16x32xf32> to vector<16x32xbf16>
    %c0_34 = arith.constant 0 : index
    %c0_35 = arith.constant 0 : index
    %124 = vector.load %arg4[%c0_34, %c0_35] : memref<32x128xbf16, #tpu.memory_space<vmem>>, vector<32x128xbf16>
    %cst_36 = arith.constant dense<0.000000e+00> : vector<16x128xf32>
    %125 = tpu.matmul %123, %124, %cst_36 {dimension_numbers = #tpu.dot_dimension_numbers<[1], [0], [0], [1], [0, 0, 1, 1], [], []>} : vector<16x32xbf16>, vector<32x128xbf16>, vector<16x128xf32> -> vector<16x128xf32>
    %126 = vector.extract_strided_slice %2 {offsets = [1, 0], sizes = [1, 128], strides = [1, 1]} : vector<8x128xf32> to vector<1x128xf32>
    %127 = vector.broadcast %126 : vector<1x128xf32> to vector<16x128xf32>
    %128 = arith.addf %125, %127 : vector<16x128xf32>
    %129 = arith.mulf %128, %128 : vector<16x128xf32>
    %130 = arith.mulf %128, %129 : vector<16x128xf32>
    %cst_37 = arith.constant 4.471500e-02 : f32
    %131 = vector.broadcast %cst_37 : f32 to vector<16x128xf32>
    %132 = arith.mulf %131, %130 : vector<16x128xf32>
    %133 = arith.addf %128, %132 : vector<16x128xf32>
    %cst_38 = arith.constant 0.797884583 : f32
    %134 = vector.broadcast %cst_38 : f32 to vector<16x128xf32>
    %135 = arith.mulf %134, %133 : vector<16x128xf32>
    %136 = math.tanh %135 : vector<16x128xf32>
    %cst_39 = arith.constant 1.000000e+00 : f32
    %137 = vector.broadcast %cst_39 : f32 to vector<16x128xf32>
    %138 = arith.addf %137, %136 : vector<16x128xf32>
    %cst_40 = arith.constant 5.000000e-01 : f32
    %139 = vector.broadcast %cst_40 : f32 to vector<16x128xf32>
    %140 = arith.mulf %139, %138 : vector<16x128xf32>
    %141 = arith.mulf %128, %140 : vector<16x128xf32>
    %142 = arith.truncf %141 : vector<16x128xf32> to vector<16x128xbf16>
    %c0_41 = arith.constant 0 : index
    %c0_42 = arith.constant 0 : index
    %143 = vector.load %arg5[%c0_41, %c0_42] : memref<128x32xbf16, #tpu.memory_space<vmem>>, vector<128x32xbf16>
    %cst_43 = arith.constant dense<0.000000e+00> : vector<16x32xf32>
    %144 = tpu.matmul %142, %143, %cst_43 {dimension_numbers = #tpu.dot_dimension_numbers<[1], [0], [0], [1], [0, 0, 1, 1], [], []>} : vector<16x128xbf16>, vector<128x32xbf16>, vector<16x32xf32> -> vector<16x32xf32>
    %145 = vector.extract_strided_slice %2 {offsets = [3, 0], sizes = [1, 32], strides = [1, 1]} : vector<8x128xf32> to vector<1x32xf32>
    %146 = vector.broadcast %145 : vector<1x32xf32> to vector<16x32xf32>
    %147 = arith.addf %144, %146 : vector<16x32xf32>
    %148 = arith.addf %147, %122 : vector<16x32xf32>
    %cst_44 = arith.constant dense<0.000000e+00> : vector<16xf32>
    %149 = vector.multi_reduction <add>, %148, %cst_44 [1] : vector<16x32xf32> to vector<16xf32>
    %150 = vector.shape_cast %149 : vector<16xf32> to vector<16x1xf32>
    %cst_45 = arith.constant 3.200000e+01 : f32
    %151 = vector.broadcast %cst_45 : f32 to vector<16x1xf32>
    %152 = arith.divf %150, %151 : vector<16x1xf32>
    %153 = vector.broadcast %152 : vector<16x1xf32> to vector<16x32xf32>
    %154 = arith.subf %148, %153 : vector<16x32xf32>
    %155 = arith.mulf %154, %154 : vector<16x32xf32>
    %cst_46 = arith.constant dense<0.000000e+00> : vector<16xf32>
    %156 = vector.multi_reduction <add>, %155, %cst_46 [1] : vector<16x32xf32> to vector<16xf32>
    %157 = vector.shape_cast %156 : vector<16xf32> to vector<16x1xf32>
    %cst_47 = arith.constant 3.200000e+01 : f32
    %158 = vector.broadcast %cst_47 : f32 to vector<16x1xf32>
    %159 = arith.divf %157, %158 : vector<16x1xf32>
    %160 = vector.broadcast %152 : vector<16x1xf32> to vector<16x32xf32>
    %161 = arith.subf %148, %160 : vector<16x32xf32>
    %cst_48 = arith.constant 9.99999997E-7 : f32
    %162 = vector.broadcast %cst_48 : f32 to vector<16x1xf32>
    %163 = arith.addf %159, %162 : vector<16x1xf32>
    %164 = math.rsqrt %163 : vector<16x1xf32>
    %165 = vector.broadcast %164 : vector<16x1xf32> to vector<16x32xf32>
    %166 = arith.mulf %161, %165 : vector<16x32xf32>
    %167 = vector.extract_strided_slice %2 {offsets = [6, 0], sizes = [1, 32], strides = [1, 1]} : vector<8x128xf32> to vector<1x32xf32>
    %168 = vector.broadcast %167 : vector<1x32xf32> to vector<16x32xf32>
    %169 = arith.mulf %166, %168 : vector<16x32xf32>
    %170 = vector.extract_strided_slice %2 {offsets = [7, 0], sizes = [1, 32], strides = [1, 1]} : vector<8x128xf32> to vector<1x32xf32>
    %171 = vector.broadcast %170 : vector<1x32xf32> to vector<16x32xf32>
    %172 = arith.addf %169, %171 : vector<16x32xf32>
    %c0_49 = arith.constant 0 : index
    %c0_50 = arith.constant 0 : index
    %173 = vector.load %arg6[%c0_49, %c0_50] : memref<16x32xf32, #tpu.memory_space<vmem>>, vector<16x32xf32>
    tpu.vector_store %arg6[%c0_49, %c0_50], %172 {strides = array<i32>} : memref<16x32xf32, #tpu.memory_space<vmem>>, vector<16x32xf32>,
    return
  }
}

</mosaic_0001>

<bundles_post_ra>
// kernel: encoder_forward.1
= control target key start
LH: loop header
LB: loop body
LE: loop exit
PB: predicated region body
PF: predicated region fallthrough
CT: control target
= control target key end

     0   :  { %v1239_v1 = vmov 0.0   ;;  %vm1240_vm0 = vmmov 0   ;;  %vm51_vm1 = vcmask 261120   ;;  %s1519_s0 = inlined_call_operand.vmem [shape: f32[16,32], index: 0, kind: input, shape index: {}]   ;;  %s1520_s1 = inlined_call_operand.vmem [shape: f32[16,16], index: 1, kind: input, shape index: {}]   ;;  %s1521_s2 = inlined_call_operand.vmem [shape: bf16[32,128], index: 2, kind: input, shape index: {}]   ;;  %s1522_s3 = inlined_call_operand.vmem [shape: f32[8,128], index: 3, kind: input, shape index: {}]   ;;  %s1523_s4 = inlined_call_operand.vmem [shape: bf16[32,128], index: 4, kind: input, shape index: {}]   ;;  %s1524_s5 = inlined_call_operand.vmem [shape: bf16[128,32], index: 5, kind: input, shape index: {}]   ;;  %s1525_s6 = inlined_call_operand.hbm [shape: f32[16,32], index: 6, kind: output, shape index: {}]  }
   0x1   :  { %v1296_v0 = vld [vmem:[%s1521_s2] sm:$0xff]   ;;  %1033 = vmatprep.subr.bf16.mxu0 %v1239_v1  ;;  %1053 = vmatprep.subr.bf16.mxu1 %v1239_v1  ;;  %v1304_v2 = vld [vmem:[%s1521_s2 + $0x8] sm:$0xff]  }
   0x2   :  { %1034 = vmatpush3.bf16.msra.mxu0 %v1296_v0  ;;  %1037 = vmatprep.mubr.msk.bf16.mxu0 %vm1240_vm0, %v1239_v1  ;;  %v1311_v3 = vld [vmem:[%s1519_s0] sm:$0xff]  ;;  %v1316_v4 = vld [vmem:[%s1519_s0 + $0x8] sm:$0xff] }
   0x3   :  { %1035 = vmatprep.subr.bf16.mxu0 %v1239_v1  ;;  %1055 = vmatprep.mubr.msk.bf16.mxu1 %vm1240_vm0, %v1239_v1  ;;  %v30_v5 = vpack.c.bf16 %v1316_v4, %v1311_v3 }
   0x6   :  { %1036 = vmatpush3.bf16.msra.mxu0 %v1304_v2 }
   0x7   :  { %1041 = vmatprep.subr.bf16.mxu0 %v1239_v1 }
   0x9   :  { %1038 = vmatmul.mubr.msk.bf16.vlgmr.msra.gmra.mrb[0].mxu0 %vm51_vm1, %v30_v5 }
   0xa   :  { %1043 = vmatprep.mubr.msk.bf16.mxu0 %vm1240_vm0, %v1239_v1 }
   0xb   :  { %11 = vsyncpa [#allocation3], 0  ;;  %v35_v6 = vlaneseq  ;;  %v1334_v9 = vld [vmem:[%s1522_s3] sm:$0xff]  ;;  %s1241_s29 = smov 120   ;;  %s1242_s30 = smov 96   ;;  %vm100_vm2 = vcmask 64512  }
   0xc   :  { %s1243_s7 = smov 80   ;;  %s1244_s3 = smov 88   ;;  %v27_v30 = vld [vmem:[%s1520_s1] sm:$0xff]  ;;  %vm152_vm3 = vcmask 130048   ;;  %v28_v34 = vld [vmem:[%s1520_s1 + $0x8] sm:$0xff]  ;;  %vm626_vm4 = vcmask 195584  }
   0xd   :  { %v1328_v7 = vshrl.u32 %v35_v6, 7  ;;  %s1245_s8 = smov 72   ;;  %s1246_s9 = smov 112  }
   0xe   :  { %s1247_s10 = smov 104   ;;  %s1248_s1 = smov 56  }
   0xf   :  { %v37_v8 = vsub.s32 0, %v1328_v7  ;;  %s1249_s15 = smov 64   ;;  %s1250_s16 = smov 48  }
  0x10   :  { %s1251_s17 = smov 40   ;;  %s1252_s18 = smov 32  }
  0x11   :  { %v38_v10 = vrot.slane %v1334_v9, %v37_v8  ;;  %s1253_s19 = smov 8   ;;  %s1254_s20 = smov 16  }
  0x12   :  { %s1255_s21 = smov 24  }
  0xdc   :  { %v89_v11 = vpop.f32.mrb[0].mxu0 }
  0xdd   :  { %v1039_v12 = vpop.f32.mrb[1].mxu0  ;;  %v90_v14 = vadd.f32 %v89_v11, %v38_v10 }
  0xde   :  { %v92_v13 = vpop.f32.mrb[2].mxu0 }
  0xdf   :  { %v93_v15 = vadd.f32 %v92_v13, %v38_v10  ;;  %v1040_v16 = vpop.f32.mrb[3].mxu0 }
  0xe1   :  { %v1337_v17 = vpack.c.bf16 %v93_v15, %v90_v14 }
  0xe3   :  { %223 = vrot.lane.b32.xlu1 %v1337_v17, %s1241_s29  ;;  %98 = vrot.lane.b32.xlu0 %v1337_v17, %s1242_s30 }
  0xe7   :  { %350 = vrot.lane.b32.xlu1 %v1337_v17, %s1243_s7  ;;  %225 = vrot.lane.b32.xlu0 %v1337_v17, %s1244_s3 }
  0xeb   :  { %475 = vrot.lane.b32.xlu1 %v1337_v17, %s1245_s8  ;;  %348 = vrot.lane.b32.xlu0 %v1337_v17, %s1246_s9 }
  0xef   :  { %473 = vrot.lane.b32.xlu0 %v1337_v17, %s1247_s10 }
 0x155   :  { %v99_v18 = vpop.permute.xlu0 %98  ;;  %v224_v20 = vpop.permute.xlu1 %223 }
 0x156   :  { %v105_v19 = vsel %vm100_vm2, %v99_v18, 0 }
 0x157   :  { %1042 = vmatpush3.bf16.xpose.msra.mxu0 %v105_v19 }
 0x158   :  { %1047 = vmatprep.subr.bf16.mxu0 %v1239_v1 }
 0x159   :  { %v226_v21 = vpop.permute.xlu0 %225  ;;  %v351_v23 = vpop.permute.xlu1 %350 }
 0x15a   :  { %v231_v22 = vsel %vm100_vm2, %v226_v21, 0  ;;  %v356_v24 = vsel %vm100_vm2, %v351_v23, 0 }
 0x15b   :  { %1054 = vmatpush3.bf16.xpose.msra.mxu1 %v231_v22 }
 0x15c   :  { %1065 = vmatprep.subr.bf16.mxu1 %v1239_v1 }
 0x15d   :  { %v476_v25 = vpop.permute.xlu1 %475  ;;  %v349_v26 = vpop.permute.xlu0 %348 }
 0x15e   :  { %1044 = vmatmul.mubr.msk.bf16.vlgmr.msra.gmra.mrb[4].mxu0 %vm100_vm2, %v1337_v17  ;;  %v481_v27 = vsel %vm100_vm2, %v476_v25, 0 }
 0x15f   :  { %1049 = vmatprep.mubr.msk.bf16.mxu0 %vm1240_vm0, %v1239_v1 }
 0x161   :  { %v474_v28 = vpop.permute.xlu0 %473 }
 0x162   :  { %1056 = vmatmul.mubr.msk.bf16.vlgmr.msra.gmra.mrb[0].mxu1 %vm100_vm2, %v224_v20 }
 0x163   :  { %1066 = vmatpush3.bf16.xpose.msra.mxu1 %v356_v24  ;;  %1067 = vmatprep.mubr.msk.bf16.mxu1 %vm1240_vm0, %v1239_v1 }
 0x164   :  { %1077 = vmatprep.subr.bf16.mxu1 %v1239_v1 }
 0x16a   :  { %1068 = vmatmul.mubr.msk.bf16.vlgmr.msra.gmra.mrb[4].mxu1 %vm100_vm2, %v349_v26 }
 0x16b   :  { %1078 = vmatpush3.bf16.xpose.msra.mxu1 %v481_v27  ;;  %1079 = vmatprep.mubr.msk.bf16.mxu1 %vm1240_vm0, %v1239_v1 }
 0x16c   :  { %1089 = vmatprep.subr.bf16.mxu1 %v1239_v1 }
 0x172   :  { %1080 = vmatmul.mubr.msk.bf16.vlgmr.msra.gmra.mrb[8].mxu1 %vm100_vm2, %v474_v28 }
 0x173   :  { %1093 = vmatprep.mubr.msk.bf16.mxu1 %vm1240_vm0, %v1239_v1 }
 0x231   :  { %v141_v29 = vpop.f32.mrb[4].mxu0 }
 0x232   :  { %v148_v31 = vmul.f32 0.35355338, %v141_v29  ;;  %v1045_v32 = vpop.f32.mrb[5].mxu0 }
 0x233   :  { %v144_v33 = vpop.f32.mrb[6].mxu0 }
 0x234   :  { %v149_v35 = vmul.f32 0.35355338, %v144_v33  ;;  %v1046_v36 = vpop.f32.mrb[7].mxu0  ;;  %v150_v37 = vadd.f32 %v148_v31, %v27_v30 }
 0x235   :  { %v267_v38 = vpop.f32.mrb[0].mxu1 }
 0x236   :  { %v274_v39 = vmul.f32 0.35355338, %v267_v38  ;;  %v1057_v40 = vpop.f32.mrb[1].mxu1  ;;  %v153_v41 = vsel %vm152_vm3, %v150_v37, -inf  ;;  %v151_v42 = vadd.f32 %v149_v35, %v28_v34 }
 0x237   :  { %v270_v43 = vpop.f32.mrb[2].mxu1  ;;  %154 = vmax.xlane.f32.xlu1 %v153_v41 }
 0x238   :  { %v275_v44 = vmul.f32 0.35355338, %v270_v43  ;;  %v1058_v45 = vpop.f32.mrb[3].mxu1  ;;  %v156_v46 = vsel %vm152_vm3, %v151_v42, -inf  ;;  %v276_v47 = vadd.f32 %v274_v39, %v27_v30 }
 0x239   :  { %157 = vmax.xlane.f32.xlu0 %v156_v46 }
 0x23a   :  { %v277_v48 = vadd.f32 %v275_v44, %v28_v34  ;;  %v278_v50 = vsel %vm152_vm3, %v276_v47, -inf }
 0x23c   :  { %v281_v49 = vsel %vm152_vm3, %v277_v48, -inf }
 0x23d   :  { %v392_v51 = vpop.f32.mrb[4].mxu1  ;;  %282 = vmax.xlane.f32.xlu1 %v281_v49  ;;  %279 = vmax.xlane.f32.xlu0 %v278_v50 }
 0x23e   :  { %v399_v52 = vmul.f32 0.35355338, %v392_v51  ;;  %v1069_v53 = vpop.f32.mrb[5].mxu1 }
 0x23f   :  { %v395_v54 = vpop.f32.mrb[6].mxu1 }
 0x240   :  { %v400_v55 = vmul.f32 0.35355338, %v395_v54  ;;  %v1070_v56 = vpop.f32.mrb[7].mxu1  ;;  %v1377_v57 = vadd.f32 %v399_v52, %v27_v30 }
 0x242   :  { %v403_v58 = vsel %vm152_vm3, %v1377_v57, -inf  ;;  %v402_v59 = vadd.f32 %v400_v55, %v28_v34 }
 0x243   :  { %404 = vmax.xlane.f32.xlu0 %v403_v58 }
 0x244   :  { %v406_v60 = vsel %vm152_vm3, %v402_v59, -inf }
 0x245   :  { %v517_v61 = vpop.f32.mrb[8].mxu1  ;;  %407 = vmax.xlane.f32.xlu1 %v406_v60 }
 0x246   :  { %v524_v62 = vmul.f32 0.35355338, %v517_v61  ;;  %v1081_v63 = vpop.f32.mrb[9].mxu1 }
 0x247   :  { %v520_v5 = vpop.f32.mrb[10].mxu1 }
 0x248   :  { %v525_v6 = vmul.f32 0.35355338, %v520_v5  ;;  %v1082_v8 = vpop.f32.mrb[11].mxu1  ;;  %v526_v10 = vadd.f32 %v524_v62, %v27_v30 }
 0x24a   :  { %v528_v11 = vsel %vm152_vm3, %v526_v10, -inf  ;;  %v527_v12 = vadd.f32 %v525_v6, %v28_v34 }
 0x24b   :  { %529 = vmax.xlane.f32.xlu0 %v528_v11 }
 0x24c   :  { %v531_v13 = vsel %vm152_vm3, %v527_v12, -inf }
 0x24d   :  { %532 = vmax.xlane.f32.xlu1 %v531_v13 }
 0x25e   :  { %301 = vrot.lane.b32.xlu1 %v1337_v17, %s1248_s1 }
 0x2c4   :  { %v155_v14 = vpop.xlane.xlu1 %154 }
 0x2c5   :  { %v159_v15 = vsub.f32 %v150_v37, %v155_v14 }
 0x2c6   :  { %v158_v16 = vpop.xlane.xlu0 %157 }
 0x2c7   :  { %v161_v18 = vmul.f32 1.442695, %v159_v15  ;;  %v160_v19 = vsub.f32 %v151_v42, %v158_v16 }
 0x2c9   :  { %1171 = vpow2.f32 %v161_v18  ;;  %v163_v20 = vmul.f32 1.442695, %v160_v19 }
 0x2ca   :  { %v283_v21 = vpop.xlane.xlu1 %282  ;;  %v280_v22 = vpop.xlane.xlu0 %279 }
 0x2cb   :  { %1173 = vpow2.f32 %v163_v20  ;;  %v285_v23 = vsub.f32 %v277_v48, %v283_v21  ;;  %v284_v24 = vsub.f32 %v276_v47, %v280_v22 }
 0x2cd   :  { %v288_v25 = vmul.f32 1.442695, %v285_v23  ;;  %v286_v26 = vmul.f32 1.442695, %v284_v24 }
 0x2cf   :  { %1175 = vpow2.f32 %v288_v25 }
 0x2d0   :  { %1177 = vpow2.f32 %v286_v26  ;;  %v405_v45 = vpop.xlane.xlu0 %404 }
 0x2d1   :  { %v409_v46 = vsub.f32 %v1377_v57, %v405_v45 }
 0x2d2   :  { %v408_v27 = vpop.xlane.xlu1 %407 }
 0x2d3   :  { %v1172_v28 = vpop.eup %1171  ;;  %v410_v29 = vsub.f32 %v402_v59, %v408_v27  ;;  %v411_v48 = vmul.f32 1.442695, %v409_v46 }
 0x2d4   :  { %v165_v30 = vsel %vm152_vm3, %v1172_v28, 0.0 }
 0x2d5   :  { %v1174_v31 = vpop.eup %1173  ;;  %v413_v32 = vmul.f32 1.442695, %v410_v29  ;;  %166 = vadd.xlane.f32.xlu0 %v165_v30 }
 0x2d6   :  { %v168_v33 = vsel %vm152_vm3, %v1174_v31, 0.0 }
 0x2d7   :  { %1179 = vpow2.f32 %v413_v32  ;;  %169 = vadd.xlane.f32.xlu1 %v168_v33 }
 0x2d8   :  { %v530_v47 = vpop.xlane.xlu0 %529 }
 0x2d9   :  { %v1176_v34 = vpop.eup %1175  ;;  %v534_v49 = vsub.f32 %v526_v10, %v530_v47 }
 0x2da   :  { %v1178_v35 = vpop.eup %1177  ;;  %v533_v36 = vpop.xlane.xlu1 %532  ;;  %v293_v37 = vsel %vm152_vm3, %v1176_v34, 0.0 }
 0x2db   :  { %v535_v38 = vsub.f32 %v527_v12, %v533_v36  ;;  %294 = vadd.xlane.f32.xlu1 %v293_v37  ;;  %v290_v39 = vsel %vm152_vm3, %v1178_v35, 0.0  ;;  %v536_v50 = vmul.f32 1.442695, %v534_v49 }
 0x2dc   :  { %291 = vadd.xlane.f32.xlu0 %v290_v39 }
 0x2dd   :  { %v538_v40 = vmul.f32 1.442695, %v535_v38 }
 0x2de   :  { %v302_v55 = vpop.permute.xlu1 %301 }
 0x2df   :  { %1181 = vpow2.f32 %v538_v40 }
 0x2e0   :  { %1183 = vpow2.f32 %v411_v48 }
 0x2e1   :  { %v1389_v41 = vpop.eup %1179  ;;  %1185 = vpow2.f32 %v536_v50 }
 0x2e2   :  { %v418_v42 = vsel %vm152_vm3, %v1389_v41, 0.0 }
 0x2e3   :  { %419 = vadd.xlane.f32.xlu1 %v418_v42 }
 0x2e9   :  { %v1393_v43 = vpop.eup %1181 }
 0x2ea   :  { %v543_v44 = vsel %vm152_vm3, %v1393_v43, 0.0  ;;  %v1184_v51 = vpop.eup %1183 }
 0x2eb   :  { %544 = vadd.xlane.f32.xlu1 %v543_v44  ;;  %v415_v52 = vsel %vm152_vm3, %v1184_v51, 0.0  ;;  %v1186_v53 = vpop.eup %1185 }
 0x2ec   :  { %v540_v54 = vsel %vm152_vm3, %v1186_v53, 0.0 }
 0x2f2   :  { %176 = vrot.lane.b32.xlu0 %v1337_v17, %s1249_s15 }
 0x2fc   :  { %426 = vrot.lane.b32.xlu1 %v1337_v17, %s1250_s16 }
 0x300   :  { %634 = vrot.lane.b32.xlu1 %v1296_v0, %s1252_s18 }
 0x311   :  { %416 = vadd.xlane.f32.xlu0 %v415_v52 }
 0x315   :  { %541 = vadd.xlane.f32.xlu0 %v540_v54 }
 0x32b   :  { %551 = vrot.lane.b32.xlu0 %v1337_v17, %s1251_s17 }
 0x362   :  { %v167_v56 = vpop.xlane.xlu0 %166 }
 0x363   :  { %1187 = vrcp.f32 %v167_v56 }
 0x364   :  { %v170_v57 = vpop.xlane.xlu1 %169 }
 0x365   :  { %1189 = vrcp.f32 %v170_v57 }
 0x368   :  { %v295_v58 = vpop.xlane.xlu1 %294 }
 0x369   :  { %1191 = vrcp.f32 %v295_v58  ;;  %v292_v59 = vpop.xlane.xlu0 %291 }
 0x36a   :  { %1193 = vrcp.f32 %v292_v59 }
 0x36d   :  { %v1188_v60 = vpop.eup %1187  ;;  %v177_v61 = vpop.permute.xlu0 %176 }
 0x36e   :  { %1048 = vmatpush3.bf16.msra.mxu0 %v177_v61  ;;  %v173_v63 = vmul.f32 %v1188_v60, %v1172_v28 }
 0x36f   :  { %v1190_v62 = vpop.eup %1189  ;;  %1059 = vmatprep.subr.bf16.mxu0 %v1239_v1 }
 0x370   :  { %v174_v5 = vmul.f32 %v1190_v62, %v1174_v31  ;;  %v420_v10 = vpop.xlane.xlu1 %419 }
 0x371   :  { %1195 = vrcp.f32 %v420_v10 }
 0x372   :  { %v175_v6 = vpack.c.bf16 %v174_v5, %v173_v63 }
 0x373   :  { %v1192_v8 = vpop.eup %1191 }
 0x374   :  { %v1194_v17 = vpop.eup %1193  ;;  %1050 = vmatmul.mubr.msk.bf16.vlgmr.msra.gmra.mrb[8].mxu0 %vm152_vm3, %v175_v6  ;;  %v299_v11 = vmul.f32 %v1192_v8, %v1176_v34  ;;  %v632_v6 = vsub.s32 2, %v1328_v7 }
 0x375   :  { %1060 = vmatpush3.bf16.msra.mxu0 %v302_v55  ;;  %1061 = vmatprep.mubr.msk.bf16.mxu0 %vm1240_vm0, %v1239_v1  ;;  %v298_v12 = vmul.f32 %v1194_v17, %v1178_v35 }
 0x376   :  { %1071 = vmatprep.subr.bf16.mxu0 %v1239_v1  ;;  %v633_v8 = vrot.slane %v1334_v9, %v632_v6 }
 0x377   :  { %v300_v14 = vpack.c.bf16 %v299_v11, %v298_v12 }
 0x378   :  { %v545_v13 = vpop.xlane.xlu1 %544 }
 0x37b   :  { %v1196_v19 = vpop.eup %1195 }
 0x37c   :  { %v427_v15 = vpop.permute.xlu1 %426  ;;  %1062 = vmatmul.mubr.msk.bf16.vlgmr.msra.gmra.mrb[12].mxu0 %vm152_vm3, %v300_v14  ;;  %v424_v21 = vmul.f32 %v1196_v19, %v1389_v41 }
 0x37d   :  { %1072 = vmatpush3.bf16.msra.mxu0 %v427_v15  ;;  %1073 = vmatprep.mubr.msk.bf16.mxu0 %vm1240_vm0, %v1239_v1 }
 0x37e   :  { %1083 = vmatprep.subr.bf16.mxu0 %v1239_v1 }
 0x380   :  { %v635_v39 = vpop.permute.xlu1 %634 }
 0x381   :  { %1090 = vmatpush3.bf16.msra.mxu1 %v635_v39 }
 0x382   :  { %1091 = vmatprep.subr.bf16.mxu1 %v1239_v1 }
 0x39e   :  { %v417_v16 = vpop.xlane.xlu0 %416 }
 0x39f   :  { %1197 = vrcp.f32 %v417_v16 }
 0x3a2   :  { %v542_v18 = vpop.xlane.xlu0 %541 }
 0x3a3   :  { %1199 = vrcp.f32 %v542_v18 }
 0x3a4   :  { %1201 = vrcp.f32 %v545_v13 }
 0x3a6   :  { %v552_v25 = vpop.permute.xlu0 %551 }
 0x3a9   :  { %v1198_v20 = vpop.eup %1197 }
 0x3aa   :  { %v423_v22 = vmul.f32 %v1198_v20, %v1184_v51 }
 0x3ac   :  { %v425_v23 = vpack.c.bf16 %v424_v21, %v423_v22 }
 0x3ad   :  { %v1200_v24 = vpop.eup %1199 }
 0x3ae   :  { %1074 = vmatmul.mubr.msk.bf16.vlgmr.msra.gmra.mrb[16].mxu0 %vm152_vm3, %v425_v23  ;;  %v1202_v26 = vpop.eup %1201  ;;  %v548_v27 = vmul.f32 %v1200_v24, %v1186_v53 }
 0x3af   :  { %1084 = vmatpush3.bf16.msra.mxu0 %v552_v25  ;;  %1085 = vmatprep.mubr.msk.bf16.mxu0 %vm1240_vm0, %v1239_v1  ;;  %v549_v28 = vmul.f32 %v1202_v26, %v1393_v43 }
 0x3b0   :  { %1097 = vmatprep.subr.bf16.mxu0 %v1239_v1 }
 0x3b1   :  { %v550_v29 = vpack.c.bf16 %v549_v28, %v548_v27 }
 0x3b6   :  { %1086 = vmatmul.mubr.msk.bf16.vlgmr.msra.gmra.mrb[20].mxu0 %vm152_vm3, %v550_v29  ;;  %v1162_v29 = vld [vmem:[%s1523_s4 + $0x8] sm:$0xff]  }
 0x3b7   :  { %1101 = vmatprep.mubr.msk.bf16.mxu0 %vm1240_vm0, %v1239_v1 }
 0x447   :  { %v216_v30 = vpop.f32.mrb[8].mxu0 }
 0x448   :  { %v1051_v31 = vpop.f32.mrb[9].mxu0 }
 0x449   :  { %v219_v32 = vpop.f32.mrb[10].mxu0 }
 0x44a   :  { %v1052_v33 = vpop.f32.mrb[11].mxu0 }
 0x44f   :  { %v341_v34 = vpop.f32.mrb[12].mxu0 }
 0x450   :  { %v1063_v35 = vpop.f32.mrb[13].mxu0 }
 0x451   :  { %v344_v36 = vpop.f32.mrb[14].mxu0 }
 0x452   :  { %v1144_v37 = vpack.i.bf16 %v344_v36, %v341_v34  ;;  %v1064_v38 = vpop.f32.mrb[15].mxu0  ;;  %v715_v36 = vsub.s32 4, %v1328_v7 }
 0x454   :  { %1145 = vrot.lane.b32.xlu0 %v1144_v37, %s1253_s19  ;;  %v716_v38 = vrot.slane %v1334_v9, %v715_v36 }
 0x481   :  { %v466_v40 = vpop.f32.mrb[16].mxu0 }
 0x482   :  { %v1075_v41 = vpop.f32.mrb[17].mxu0 }
 0x483   :  { %v469_v42 = vpop.f32.mrb[18].mxu0 }
 0x484   :  { %v1149_v0 = vpack.i.bf16 %v469_v42, %v466_v40  ;;  %v1076_v43 = vpop.f32.mrb[19].mxu0  ;;  %v721_v40 = vsub.s32 5, %v1328_v7 }
 0x486   :  { %1150 = vrot.lane.b32.xlu1 %v1149_v0, %s1254_s20  ;;  %v722_v43 = vrot.slane %v1334_v9, %v721_v40 }
 0x489   :  { %v591_v44 = vpop.f32.mrb[20].mxu0 }
 0x48a   :  { %v1087_v45 = vpop.f32.mrb[21].mxu0  ;;  %636 = vrot.lane.b32.xlu1 %v1304_v2, %s1252_s18 }
 0x48b   :  { %v594_v46 = vpop.f32.mrb[22].mxu0 }
 0x48c   :  { %v1154_v47 = vpack.i.bf16 %v594_v46, %v591_v44  ;;  %v1088_v48 = vpop.f32.mrb[23].mxu0 }
 0x48d   :  { %v1163_v48 = vld [vmem:[%s1524_s5] sm:$0xff]  }
 0x48e   :  { %1155 = vrot.lane.b32.xlu0 %v1154_v47, %s1255_s21 }
 0x4c6   :  { %v1146_v50 = vpop.permute.xlu0 %1145 }
 0x4c7   :  { %v1148_v52 = vunpack.i.h.bf16 %v1146_v50  ;;  %v1147_v53 = vunpack.i.l.bf16 %v1146_v50  ;;  %v1165_v50 = vld [vmem:[%s1524_s5 + $0x10] sm:$0xff]  }
 0x4c9   :  { %v623_v57 = vsel %vm100_vm2, %v219_v32, %v1148_v52  ;;  %v622_v2 = vsel %vm100_vm2, %v216_v30, %v1147_v53  ;;  %v1167_v52 = vld [vmem:[%s1524_s5 + $0x20] sm:$0xff]   ;;  %v1168_v53 = vld [vmem:[%s1524_s5 + $0x28] sm:$0xff]  }
 0x4f8   :  { %v1151_v49 = vpop.permute.xlu1 %1150 }
 0x4f9   :  { %v1153_v54 = vunpack.i.h.bf16 %v1151_v49  ;;  %v1152_v55 = vunpack.i.l.bf16 %v1151_v49  ;;  %v1164_v49 = vld [vmem:[%s1524_s5 + $0x8] sm:$0xff]  }
 0x4fb   :  { %v625_v60 = vsel %vm152_vm3, %v623_v57, %v1153_v54  ;;  %v624_v61 = vsel %vm152_vm3, %v622_v2, %v1152_v55  ;;  %v1169_v54 = vld [vmem:[%s1524_s5 + $0x30] sm:$0xff]   ;;  %v1170_v55 = vld [vmem:[%s1524_s5 + $0x38] sm:$0xff]  }
 0x4fc   :  { %v637_v51 = vpop.permute.xlu1 %636 }
 0x4fd   :  { %1092 = vmatpush3.bf16.msra.mxu1 %v637_v51  ;;  %v1166_v51 = vld [vmem:[%s1524_s5 + $0x18] sm:$0xff]   ;;  %s1256_s5 = smov [#allocation2]  }
 0x4fe   :  { %1105 = vmatprep.subr.bf16.mxu1 %v1239_v1  ;;  %s965_s14 = sshll.u32 %s1256_s5, 4  ;;  %s966_s14 = int_to_ptr.vmem [resolvable:$true] %s965_s14 }
 0x4ff   :  { %s1215_s1 = scalar_lea.vmem %s966_s14, 256  ;;  %p1220_p1 = scmp.lt.s32.totalorder %s966_s14, %s966_s14 }
 0x500   :  { %v1156_v56 = vpop.permute.xlu0 %1155  ;;  %p1216_p0 = scmp.ne.s32.totalorder %s966_s14, %s1215_s1  ;;  %p1221_p2 = scmp.lt.s32.totalorder %s1215_s1, %s1215_s1 }
 0x501   :  { %v1158_v58 = vunpack.i.h.bf16 %v1156_v56  ;;  %v1157_v59 = vunpack.i.l.bf16 %v1156_v56  ;;  %v732_v56 = vsub.s32 1, %v1328_v7 }
 0x502   :  { %p1222_p3 = por %p1221_p2, %p1220_p1 }
 0x503   :  { %v628_v62 = vsel %vm626_vm4, %v625_v60, %v1158_v58  ;;  %v627_v63 = vsel %vm626_vm4, %v624_v61, %v1157_v59  ;;  %v733_v57 = vrot.slane %v1334_v9, %v732_v56 }
 0x504   :  { %v629_v5 = vpack.c.bf16 %v628_v62, %v627_v63  ;;  %p1223_p4 = pnand %p1222_p3, %p1216_p0 }
 0x506   :  { %1094 = vmatmul.mubr.msk.bf16.vlgmr.msra.gmra.mrb[12].mxu1 %vm51_vm1, %v629_v5 }
 0x507   :  { %1121 = vmatprep.mubr.msk.bf16.mxu1 %vm1240_vm0, %v1239_v1  ;;  %1106 = vmatpush3.bf16.msra.mxu1 %v1163_v48 }
 0x508   :  { %1107 = vmatprep.subr.bf16.mxu1 %v1239_v1 }
 0x50b   :  { %1108 = vmatpush3.bf16.msra.mxu1 %v1164_v49  ;;  %v948_v49 = vsub.s32 6, %v1328_v7 }
 0x50c   :  { %1109 = vmatprep.subr.bf16.mxu1 %v1239_v1 }
 0x50f   :  { %1110 = vmatpush3.bf16.msra.mxu1 %v1165_v50  ;;  %v954_v50 = vsub.s32 7, %v1328_v7 }
 0x510   :  { %1111 = vmatprep.subr.bf16.mxu1 %v1239_v1 }
 0x513   :  { %1112 = vmatpush3.bf16.msra.mxu1 %v1166_v51  ;;  %v949_v51 = vrot.slane %v1334_v9, %v948_v49 }
 0x514   :  { %1113 = vmatprep.subr.bf16.mxu1 %v1239_v1 }
 0x517   :  { %1114 = vmatpush3.bf16.msra.mxu1 %v1167_v52 }
 0x518   :  { %1115 = vmatprep.subr.bf16.mxu1 %v1239_v1 }
 0x51b   :  { %1116 = vmatpush3.bf16.msra.mxu1 %v1168_v53 }
 0x51c   :  { %1117 = vmatprep.subr.bf16.mxu1 %v1239_v1 }
 0x51f   :  { %1118 = vmatpush3.bf16.msra.mxu1 %v1169_v54  ;;  %v955_v54 = vrot.slane %v1334_v9, %v954_v50 }
 0x520   :  { %1119 = vmatprep.subr.bf16.mxu1 %v1239_v1 }
 0x523   :  { %1120 = vmatpush3.bf16.msra.mxu1 %v1170_v55 }
 0x5d9   :  { %v677_v17 = vpop.f32.mrb[12].mxu1 }
 0x5da   :  { %v678_v10 = vadd.f32 %v677_v17, %v633_v8  ;;  %v1095_v11 = vpop.f32.mrb[13].mxu1 }
 0x5db   :  { %v680_v12 = vpop.f32.mrb[14].mxu1 }
 0x5dc   :  { %v681_v13 = vadd.f32 %v680_v12, %v633_v8  ;;  %v1096_v14 = vpop.f32.mrb[15].mxu1  ;;  %v684_v15 = vadd.f32 %v678_v10, %v1311_v3 }
 0x5de   :  { %v686_v16 = vsel %vm51_vm1, %v684_v15, 0.0  ;;  %v685_v18 = vadd.f32 %v681_v13, %v1316_v4  ;;  %v1161_v4 = vld [vmem:[%s1523_s4] sm:$0xff]  }
 0x5df   :  { %687 = vadd.xlane.f32.xlu0 %v686_v16  ;;  %1098 = vmatpush3.bf16.msra.mxu0 %v1161_v4 }
 0x5e0   :  { %v689_v19 = vsel %vm51_vm1, %v685_v18, 0.0  ;;  %1099 = vmatprep.subr.bf16.mxu0 %v1239_v1 }
 0x5e1   :  { %690 = vadd.xlane.f32.xlu1 %v689_v19 }
 0x5e3   :  { %1100 = vmatpush3.bf16.msra.mxu0 %v1162_v29 }
 0x66c   :  { %v688_v20 = vpop.xlane.xlu0 %687 }
 0x66d   :  { %v693_v21 = vmul.f32 0.03125, %v688_v20 }
 0x66e   :  { %v691_v22 = vpop.xlane.xlu1 %690 }
 0x66f   :  { %v695_v23 = vsub.f32 %v684_v15, %v693_v21  ;;  %v694_v24 = vmul.f32 0.03125, %v691_v22 }
 0x671   :  { %v696_v25 = vsub.f32 %v685_v18, %v694_v24  ;;  %v697_v26 = vmul.f32 %v695_v23, %v695_v23  ;;  %v827_v24 = vsub.s32 3, %v1328_v7 }
 0x673   :  { %v699_v27 = vsel %vm51_vm1, %v697_v26, 0.0  ;;  %v698_v28 = vmul.f32 %v696_v25, %v696_v25 }
 0x674   :  { %700 = vadd.xlane.f32.xlu0 %v699_v27 }
 0x675   :  { %v702_v3 = vsel %vm51_vm1, %v698_v28, 0.0 }
 0x678   :  { %703 = vadd.xlane.f32.xlu0 %v702_v3 }
 0x701   :  { %v701_v30 = vpop.xlane.xlu0 %700 }
 0x702   :  { %v705_v31 = vmul.f32 0.03125, %v701_v30 }
 0x704   :  { %v707_v32 = vadd.f32 1e-06, %v705_v31 }
 0x705   :  { %v704_v33 = vpop.xlane.xlu0 %703 }
 0x706   :  { %1203 = vrsqrt.f32 %v707_v32  ;;  %v706_v34 = vmul.f32 0.03125, %v704_v33 }
 0x708   :  { %v708_v35 = vadd.f32 1e-06, %v706_v34 }
 0x70a   :  { %1205 = vrsqrt.f32 %v708_v35 }
 0x710   :  { %v1204_v37 = vpop.eup %1203 }
 0x711   :  { %v711_v39 = vmul.f32 %v1204_v37, %v695_v23 }
 0x713   :  { %v717_v42 = vmul.f32 %v716_v38, %v711_v39 }
 0x714   :  { %v1206_v41 = vpop.eup %1205 }
 0x715   :  { %v712_v0 = vmul.f32 %v1206_v41, %v696_v25  ;;  %v1452_v45 = vadd.f32 %v722_v43, %v717_v42  ;;  %v828_v25 = vrot.slane %v1334_v9, %v827_v24 }
 0x717   :  { %v718_v44 = vmul.f32 %v716_v38, %v712_v0 }
 0x719   :  { %v1454_v46 = vadd.f32 %v722_v43, %v718_v44 }
 0x71b   :  { %v725_v47 = vpack.c.bf16 %v1454_v46, %v1452_v45 }
 0x71d   :  { %1102 = vmatmul.mubr.msk.bf16.vlgmr.msra.gmra.mrb[24].mxu0 %vm51_vm1, %v725_v47 }
 0x7f0   :  { %v783_v2 = vpop.f32.mrb[24].mxu0 }
 0x7f1   :  { %v784_v58 = vadd.f32 %v783_v2, %v733_v57  ;;  %v1103_v59 = vpop.f32.mrb[25].mxu0 }
 0x7f2   :  { %v786_v60 = vpop.f32.mrb[26].mxu0 }
 0x7f3   :  { %v790_v61 = vmul.f32 %v784_v58, %v784_v58  ;;  %v787_v62 = vadd.f32 %v786_v60, %v733_v57  ;;  %v1104_v63 = vpop.f32.mrb[27].mxu0 }
 0x7f5   :  { %v792_v5 = vmul.f32 %v790_v61, %v784_v58  ;;  %v791_v6 = vmul.f32 %v787_v62, %v787_v62 }
 0x7f7   :  { %v794_v8 = vmul.f32 0.044715, %v792_v5  ;;  %v793_v1 = vmul.f32 %v791_v6, %v787_v62 }
 0x7f9   :  { %v796_v17 = vadd.f32 %v794_v8, %v784_v58  ;;  %v795_v10 = vmul.f32 0.044715, %v793_v1 }
 0x7fb   :  { %v798_v11 = vmul.f32 0.7978846, %v796_v17  ;;  %v797_v12 = vadd.f32 %v795_v10, %v787_v62 }
 0x7fd   :  { %1207 = vtanh.f32 %v798_v11  ;;  %v799_v13 = vmul.f32 0.7978846, %v797_v12 }
 0x7ff   :  { %1209 = vtanh.f32 %v799_v13 }
 0x807   :  { %v1208_v14 = vpop.eup %1207 }
 0x808   :  { %v802_v15 = vadd.f32 1.0, %v1208_v14 }
 0x809   :  { %v1210_v16 = vpop.eup %1209 }
 0x80a   :  { %v804_v18 = vmul.f32 0.5, %v802_v15  ;;  %v803_v19 = vadd.f32 1.0, %v1210_v16 }
 0x80c   :  { %v805_v20 = vmul.f32 0.5, %v803_v19  ;;  %v806_v21 = vmul.f32 %v804_v18, %v784_v58 }
 0x80e   :  { %v807_v22 = vmul.f32 %v805_v20, %v787_v62 }
 0x810   :  { %v808_v23 = vpack.c.bf16 %v807_v22, %v806_v21 }
 0x812   :  { %1122 = vmatmul.mubr.bf16.vlgmr.msra.gmra.mrb[16].mxu1 %v808_v23 }
 0x8e5   :  { %v911_v26 = vpop.f32.mrb[16].mxu1 }
 0x8e6   :  { %v912_v27 = vadd.f32 %v911_v26, %v828_v25  ;;  %v1123_v28 = vpop.f32.mrb[17].mxu1 }
 0x8e7   :  { %v914_v3 = vpop.f32.mrb[18].mxu1 }
 0x8e8   :  { %v915_v4 = vadd.f32 %v914_v3, %v828_v25  ;;  %v1124_v29 = vpop.f32.mrb[19].mxu1  ;;  %v918_v30 = vadd.f32 %v912_v27, %v1452_v45 }
 0x8ea   :  { %v920_v31 = vsel %vm51_vm1, %v918_v30, 0.0  ;;  %v919_v32 = vadd.f32 %v915_v4, %v1454_v46 }
 0x8eb   :  { %921 = vadd.xlane.f32.xlu1 %v920_v31 }
 0x8ec   :  { %v923_v33 = vsel %vm51_vm1, %v919_v32, 0.0 }
 0x8ed   :  { %924 = vadd.xlane.f32.xlu0 %v923_v33 }
 0x978   :  { %v922_v34 = vpop.xlane.xlu1 %921 }
 0x979   :  { %v926_v35 = vmul.f32 0.03125, %v922_v34 }
 0x97a   :  { %v925_v36 = vpop.xlane.xlu0 %924 }
 0x97b   :  { %v928_v37 = vsub.f32 %v918_v30, %v926_v35  ;;  %v927_v38 = vmul.f32 0.03125, %v925_v36 }
 0x97d   :  { %v929_v39 = vsub.f32 %v919_v32, %v927_v38  ;;  %v930_v40 = vmul.f32 %v928_v37, %v928_v37 }
 0x97f   :  { %v932_v41 = vsel %vm51_vm1, %v930_v40, 0.0  ;;  %v931_v42 = vmul.f32 %v929_v39, %v929_v39 }
 0x980   :  { %933 = vadd.xlane.f32.xlu1 %v932_v41 }
 0x981   :  { %v935_v0 = vsel %vm51_vm1, %v931_v42, 0.0 }
 0x982   :  { %936 = vadd.xlane.f32.xlu0 %v935_v0 }
 0xa0d   :  { %v934_v43 = vpop.xlane.xlu1 %933 }
 0xa0e   :  { %v938_v44 = vmul.f32 0.03125, %v934_v43 }
 0xa0f   :  { %v937_v45 = vpop.xlane.xlu0 %936 }
 0xa10   :  { %v940_v46 = vadd.f32 1e-06, %v938_v44  ;;  %v939_v47 = vmul.f32 0.03125, %v937_v45 }
 0xa12   :  { %1211 = vrsqrt.f32 %v940_v46  ;;  %v941_v48 = vadd.f32 1e-06, %v939_v47 }
 0xa14   :  { %1213 = vrsqrt.f32 %v941_v48 }
 0xa1c   :  { %v1212_v52 = vpop.eup %1211 }
 0xa1d   :  { %v944_v53 = vmul.f32 %v1212_v52, %v928_v37 }
 0xa1e   :  { %v1214_v55 = vpop.eup %1213 }
 0xa1f   :  { %v945_v56 = vmul.f32 %v1214_v55, %v929_v39  ;;  %v950_v57 = vmul.f32 %v949_v51, %v944_v53 }
 0xa21   :  { %v951_v2 = vmul.f32 %v949_v51, %v945_v56  ;;  %v956_v58 = vadd.f32 %v955_v54, %v950_v57 }
 0xa23   :  { %v957_v59 = vadd.f32 %v955_v54, %v951_v2  ;;  %958 = vst.msk [vmem:[#allocation2] sm:$0xff] %vm51_vm1, %v956_v58 }
 0xa25   :  { %959 = vst.msk [vmem:[#allocation2 + $0x8] sm:$0xff] %vm51_vm1, %v957_v59 }
 0xa26   :  { %1226 = shalt.err (!%p1223_p4)
}
 0xa27   :  { %s1227_s17 = scalar_lea.hbm %s1525_s6, 256 }
 0xa28   :  { %p1228_p5 = scmp.ne.s32.totalorder %s1525_s6, %s1227_s17  ;;  %p1231_p6 = scmp.lt.u32.totalorder %s1227_s17, %s1525_s6 }
 0xa2a   :  { %p1233_p7 = pnand %p1231_p6, %p1228_p5 }
 0xa2c   :  { %1236 = shalt.err (!%p1233_p7)
}
 0xa2d   :  { %s1257_s23 = smov 128  }
 0xa2e   :  { %971 = dma.vmem_to_hbm [thread:$0]  %s966_s14, 256, %s1525_s6, [#allocation3], %s1257_s23, %s1257_s23, %s1253_s19  }
 0xa2f   :  { %1237 = dma.done.wait [#allocation3], 256  }
 0xa30   :  { %1238 = vsyncadd [#allocation3], 4294967040 }
 0xa31   :  { %975 = vsyncpa [#allocation3], 1 }

</bundles_post_ra>
